<compile_context>
chip_gen: v7x
topology: tpu7x:2x2x1
jax: 0.10.0
libtpu: 0.0.40
codegen_flags: <defaults>
</compile_context>

<pallas_src>
import functools

import jax
import jax.numpy as jnp
from jax.experimental import pallas as pl
from jax.experimental.pallas import tpu as pltpu

PAD = 128  # common lane-dense feature width; every real dim (<=102) fits in one tile


def _round_up(x, m):
    return ((x + m - 1) // m) * m


def mlp_slab_kernel(x_ref, w_ref, b_ref, o_ref):
    """x_ref: (TM, PAD); w_ref: (L, PAD, PAD); b_ref: (L, 1, PAD); o_ref: (TM, PAD).

    All feature dims pre-padded to PAD with zeros (zero weight rows/cols, zero
    bias), so padded lanes stay exactly zero through every layer/ReLU.
    """
    n_layers = w_ref.shape[0]
    h = x_ref[...]
    for i in range(n_layers):  # static unroll over the 5 layers
        h = jnp.dot(h, w_ref[i], preferred_element_type=jnp.float32) + b_ref[i, 0:1, :]
        if i < n_layers - 1:
            h = jnp.maximum(h, 0.0)
    o_ref[...] = h.astype(o_ref.dtype)


def pack_params(params):
    """Pack per-layer (W: (in,out), b: (out,)) into zero-padded slabs ONCE (init time).

    Returns w_slab: (L, PAD, PAD) f32, b_slab: (L, 1, PAD) f32.
    """
    n_layers = len(params)
    w_slab = jnp.zeros((n_layers, PAD, PAD), jnp.float32)
    b_slab = jnp.zeros((n_layers, 1, PAD), jnp.float32)
    for i, (w, b) in enumerate(params):
        assert w.shape[0] <= PAD and w.shape[1] <= PAD, "feature dim exceeds PAD=128"
        w_slab = w_slab.at[i, : w.shape[0], : w.shape[1]].set(w.astype(jnp.float32))
        b_slab = b_slab.at[i, 0, : b.shape[-1]].set(b.reshape(-1).astype(jnp.float32))
    return w_slab, b_slab


def _select_tile(batch):
    # Small/medium batch: one sublane-aligned tile; duplicating the ~320 KiB
    # weight DMA across v7x's two TCs isn't worth it at this size.
    if batch <= 256:
        return _round_up(max(batch, 1), 8)
    # Large batch: >=2 tiles (v7x megacore), pick the candidate minimizing
    # padded rows; on ties prefer the bigger tile (amortize per-step overhead).
    candidates = (128, 256, 512)
    return min(candidates, key=lambda t: (_round_up(batch, t) - batch, -t))


@functools.partial(jax.jit, static_argnames=("max_char",))
def net_forward(x, w_slab, b_slab, max_char):
    """x: (batch, in_features) f32. w_slab/b_slab from pack_params.
    Returns (batch, max_char)."""
    batch, in_features = x.shape
    n_layers = w_slab.shape[0]

    tm = _select_tile(batch)
    grid_m = pl.cdiv(batch, tm)
    batch_p = grid_m * tm

    # One fused pad: rows up to the tile multiple, cols up to lane-dense PAD.
    x_p = jnp.pad(x.astype(jnp.float32), ((0, batch_p - batch), (0, PAD - in_features)))

    flops = 2 * n_layers * batch_p * PAD * PAD
    bytes_accessed = 4 * (w_slab.size + b_slab.size + x_p.size + batch_p * PAD)

    out_p = pl.pallas_call(
        mlp_slab_kernel,
        out_shape=jax.ShapeDtypeStruct((batch_p, PAD), jnp.float32),
        grid=(grid_m,),
        in_specs=[
            # x tile: pipelined across the batch grid.
            pl.BlockSpec((tm, PAD), lambda i: (i, 0)),
            # Weights/biases: grid-invariant -> VMEM-resident, single-buffered.
            pl.BlockSpec((n_layers, PAD, PAD), lambda i: (0, 0, 0),
                         pipeline_mode=pl.Buffered(1)),
            pl.BlockSpec((n_layers, 1, PAD), lambda i: (0, 0, 0),
                         pipeline_mode=pl.Buffered(1)),
        ],
        out_specs=pl.BlockSpec((tm, PAD), lambda i: (i, 0)),
        compiler_params=pltpu.CompilerParams(
            dimension_semantics=("parallel",),  # shard batch tiles across TCs on v7x
        ),
        cost_estimate=pl.CostEstimate(
            flops=flops, transcendentals=0, bytes_accessed=bytes_accessed),
    )(x_p, w_slab, b_slab)

    return out_p[:batch, :max_char]


def init_net_params(key, layers, num_lines_predict=1, max_char=102):
    """Deterministic init mirroring PyTorch nn.Linear shapes.

    Net: fc1 (max_char*num_lines_predict -> layers[0]), fc2..fc4 between layers
    entries, fc5 (layers[-1] -> max_char).  Weights stored as (in, out)."""
    dims = [max_char * num_lines_predict] + list(layers) + [max_char]
    params = []
    for i in range(len(dims) - 1):
        fan_in, fan_out = dims[i], dims[i + 1]
        key, kw, kb = jax.random.split(key, 3)
        bound = 1.0 / jnp.sqrt(jnp.float32(fan_in))
        w = jax.random.uniform(kw, (fan_in, fan_out), jnp.float32, -bound, bound)
        b = jax.random.uniform(kb, (fan_out,), jnp.float32, -bound, bound)
        params.append((w, b))
    return params


def reference_forward(x, params):
    h = x
    for i, (w, b) in enumerate(params):
        h = h @ w + b[None, :]
        if i < len(params) - 1:
            h = jnp.maximum(h, 0.0)
    return h


if __name__ == "__main__":
    key = jax.random.PRNGKey(0)
    num_lines_predict = 1
    max_char = 102
    layers = [64, 48, 32, 32]  # 4 entries -> 5 Linear layers (fc1..fc5)

    kp, kx1, kx2 = jax.random.split(key, 3)
    params = init_net_params(kp, layers, num_lines_predict, max_char)
    # Pack once, outside the hot path (per review).
    w_slab, b_slab = pack_params(params)

    # Small batch (matches typical use) and a non-multiple-of-8 batch to
    # exercise the last-tile-only padding path.
    for batch, kx in ((8, kx1), (13, kx2)):
        x = jax.random.normal(kx, (batch, max_char * num_lines_predict), jnp.float32)
        out = jax.block_until_ready(net_forward(x, w_slab, b_slab, max_char))
        ref = reference_forward(x, params)
        assert out.shape == (batch, max_char), out.shape
        assert jnp.allclose(out, ref, atol=1e-4, rtol=1e-4), "mismatch vs reference"

    print("KERNEL_OK")
</pallas_src>

<mosaic_0001>
module attributes {stable_mosaic.version = 11 : i64} {
  func.func @mlp_slab_kernel(%arg0: i32, %arg1: memref<8x128xf32, #tpu.memory_space<vmem>>, %arg2: memref<5x128x128xf32, #tpu.memory_space<vmem>>, %arg3: memref<5x1x128xf32, #tpu.memory_space<vmem>>, %arg4: memref<8x128xf32, #tpu.memory_space<vmem>>) attributes {dimension_semantics = [#tpu.dimension_semantics<parallel>], iteration_bounds = array<i64: 1>, scalar_prefetch = 0 : i64, scratch_operands = 0 : i64, tpu.core_type = #tpu.core_type<tc>, window_params = [{transform_indices = @transform_0, window_bounds = array<i64: 8, 128>}, {pipeline_mode = #tpu.pipeline_mode<synchronous>, transform_indices = @transform_1, window_bounds = array<i64: 5, 128, 128>}, {pipeline_mode = #tpu.pipeline_mode<synchronous>, transform_indices = @transform_2, window_bounds = array<i64: 5, 1, 128>}, {transform_indices = @transform_3, window_bounds = array<i64: 8, 128>}]} {
    %c0 = arith.constant 0 : index
    %c0_0 = arith.constant 0 : index
    %0 = vector.load %arg1[%c0, %c0_0] : memref<8x128xf32, #tpu.memory_space<vmem>>, vector<8x128xf32>
    %c0_1 = arith.constant 0 : index
    %c0_2 = arith.constant 0 : index
    %c0_3 = arith.constant 0 : index
    %1 = vector.load %arg2[%c0_1, %c0_2, %c0_3] : memref<5x128x128xf32, #tpu.memory_space<vmem>>, vector<1x128x128xf32>
    %2 = vector.shape_cast %1 : vector<1x128x128xf32> to vector<128x128xf32>
    %cst = arith.constant dense<0.000000e+00> : vector<8x128xf32>
    %3 = tpu.matmul %0, %2, %cst {dimension_numbers = #tpu.dot_dimension_numbers<[1], [0], [0], [1], [0, 0, 1, 1], [], []>} : vector<8x128xf32>, vector<128x128xf32>, vector<8x128xf32> -> vector<8x128xf32>
    %c0_4 = arith.constant 0 : index
    %c0_5 = arith.constant 0 : index
    %c0_6 = arith.constant 0 : index
    %4 = vector.load %arg3[%c0_4, %c0_5, %c0_6] : memref<5x1x128xf32, #tpu.memory_space<vmem>>, vector<1x1x128xf32>
    %5 = vector.shape_cast %4 : vector<1x1x128xf32> to vector<1x128xf32>
    %6 = vector.broadcast %5 : vector<1x128xf32> to vector<8x128xf32>
    %7 = arith.addf %3, %6 : vector<8x128xf32>
    %cst_7 = arith.constant 0.000000e+00 : f32
    %8 = vector.broadcast %cst_7 : f32 to vector<8x128xf32>
    %9 = arith.maximumf %7, %8 : vector<8x128xf32>
    %c1 = arith.constant 1 : index
    %c0_8 = arith.constant 0 : index
    %c0_9 = arith.constant 0 : index
    %10 = vector.load %arg2[%c1, %c0_8, %c0_9] : memref<5x128x128xf32, #tpu.memory_space<vmem>>, vector<1x128x128xf32>
    %11 = vector.shape_cast %10 : vector<1x128x128xf32> to vector<128x128xf32>
    %cst_10 = arith.constant dense<0.000000e+00> : vector<8x128xf32>
    %12 = tpu.matmul %9, %11, %cst_10 {dimension_numbers = #tpu.dot_dimension_numbers<[1], [0], [0], [1], [0, 0, 1, 1], [], []>} : vector<8x128xf32>, vector<128x128xf32>, vector<8x128xf32> -> vector<8x128xf32>
    %c1_11 = arith.constant 1 : index
    %c0_12 = arith.constant 0 : index
    %c0_13 = arith.constant 0 : index
    %13 = vector.load %arg3[%c1_11, %c0_12, %c0_13] : memref<5x1x128xf32, #tpu.memory_space<vmem>>, vector<1x1x128xf32>
    %14 = vector.shape_cast %13 : vector<1x1x128xf32> to vector<1x128xf32>
    %15 = vector.broadcast %14 : vector<1x128xf32> to vector<8x128xf32>
    %16 = arith.addf %12, %15 : vector<8x128xf32>
    %cst_14 = arith.constant 0.000000e+00 : f32
    %17 = vector.broadcast %cst_14 : f32 to vector<8x128xf32>
    %18 = arith.maximumf %16, %17 : vector<8x128xf32>
    %c2 = arith.constant 2 : index
    %c0_15 = arith.constant 0 : index
    %c0_16 = arith.constant 0 : index
    %19 = vector.load %arg2[%c2, %c0_15, %c0_16] : memref<5x128x128xf32, #tpu.memory_space<vmem>>, vector<1x128x128xf32>
    %20 = vector.shape_cast %19 : vector<1x128x128xf32> to vector<128x128xf32>
    %cst_17 = arith.constant dense<0.000000e+00> : vector<8x128xf32>
    %21 = tpu.matmul %18, %20, %cst_17 {dimension_numbers = #tpu.dot_dimension_numbers<[1], [0], [0], [1], [0, 0, 1, 1], [], []>} : vector<8x128xf32>, vector<128x128xf32>, vector<8x128xf32> -> vector<8x128xf32>
    %c2_18 = arith.constant 2 : index
    %c0_19 = arith.constant 0 : index
    %c0_20 = arith.constant 0 : index
    %22 = vector.load %arg3[%c2_18, %c0_19, %c0_20] : memref<5x1x128xf32, #tpu.memory_space<vmem>>, vector<1x1x128xf32>
    %23 = vector.shape_cast %22 : vector<1x1x128xf32> to vector<1x128xf32>
    %24 = vector.broadcast %23 : vector<1x128xf32> to vector<8x128xf32>
    %25 = arith.addf %21, %24 : vector<8x128xf32>
    %cst_21 = arith.constant 0.000000e+00 : f32
    %26 = vector.broadcast %cst_21 : f32 to vector<8x128xf32>
    %27 = arith.maximumf %25, %26 : vector<8x128xf32>
    %c3 = arith.constant 3 : index
    %c0_22 = arith.constant 0 : index
    %c0_23 = arith.constant 0 : index
    %28 = vector.load %arg2[%c3, %c0_22, %c0_23] : memref<5x128x128xf32, #tpu.memory_space<vmem>>, vector<1x128x128xf32>
    %29 = vector.shape_cast %28 : vector<1x128x128xf32> to vector<128x128xf32>
    %cst_24 = arith.constant dense<0.000000e+00> : vector<8x128xf32>
    %30 = tpu.matmul %27, %29, %cst_24 {dimension_numbers = #tpu.dot_dimension_numbers<[1], [0], [0], [1], [0, 0, 1, 1], [], []>} : vector<8x128xf32>, vector<128x128xf32>, vector<8x128xf32> -> vector<8x128xf32>
    %c3_25 = arith.constant 3 : index
    %c0_26 = arith.constant 0 : index
    %c0_27 = arith.constant 0 : index
    %31 = vector.load %arg3[%c3_25, %c0_26, %c0_27] : memref<5x1x128xf32, #tpu.memory_space<vmem>>, vector<1x1x128xf32>
    %32 = vector.shape_cast %31 : vector<1x1x128xf32> to vector<1x128xf32>
    %33 = vector.broadcast %32 : vector<1x128xf32> to vector<8x128xf32>
    %34 = arith.addf %30, %33 : vector<8x128xf32>
    %cst_28 = arith.constant 0.000000e+00 : f32
    %35 = vector.broadcast %cst_28 : f32 to vector<8x128xf32>
    %36 = arith.maximumf %34, %35 : vector<8x128xf32>
    %c4 = arith.constant 4 : index
    %c0_29 = arith.constant 0 : index
    %c0_30 = arith.constant 0 : index
    %37 = vector.load %arg2[%c4, %c0_29, %c0_30] : memref<5x128x128xf32, #tpu.memory_space<vmem>>, vector<1x128x128xf32>
    %38 = vector.shape_cast %37 : vector<1x128x128xf32> to vector<128x128xf32>
    %cst_31 = arith.constant dense<0.000000e+00> : vector<8x128xf32>
    %39 = tpu.matmul %36, %38, %cst_31 {dimension_numbers = #tpu.dot_dimension_numbers<[1], [0], [0], [1], [0, 0, 1, 1], [], []>} : vector<8x128xf32>, vector<128x128xf32>, vector<8x128xf32> -> vector<8x128xf32>
    %c4_32 = arith.constant 4 : index
    %c0_33 = arith.constant 0 : index
    %c0_34 = arith.constant 0 : index
    %40 = vector.load %arg3[%c4_32, %c0_33, %c0_34] : memref<5x1x128xf32, #tpu.memory_space<vmem>>, vector<1x1x128xf32>
    %41 = vector.shape_cast %40 : vector<1x1x128xf32> to vector<1x128xf32>
    %42 = vector.broadcast %41 : vector<1x128xf32> to vector<8x128xf32>
    %43 = arith.addf %39, %42 : vector<8x128xf32>
    %c0_35 = arith.constant 0 : index
    %c0_36 = arith.constant 0 : index
    %44 = vector.load %arg4[%c0_35, %c0_36] : memref<8x128xf32, #tpu.memory_space<vmem>>, vector<8x128xf32>
    tpu.vector_store %arg4[%c0_35, %c0_36], %43 {strides = array<i32>} : memref<8x128xf32, #tpu.memory_space<vmem>>, vector<8x128xf32>,
    return
  }
  func.func @transform_0(%arg0: i32) -> (i32, i32) {
    %c0_i32 = arith.constant 0 : i32
    %c0_i32_0 = arith.constant 0 : i32
    return %arg0, %c0_i32 : i32, i32
  }
  func.func @transform_1(%arg0: i32) -> (i32, i32, i32) {
    %c0_i32 = arith.constant 0 : i32
    %c0_i32_0 = arith.constant 0 : i32
    %c0_i32_1 = arith.constant 0 : i32
    %c0_i32_2 = arith.constant 0 : i32
    return %c0_i32, %c0_i32_0, %c0_i32_1 : i32, i32, i32
  }
  func.func @transform_2(%arg0: i32) -> (i32, i32, i32) {
    %c0_i32 = arith.constant 0 : i32
    %c0_i32_0 = arith.constant 0 : i32
    %c0_i32_1 = arith.constant 0 : i32
    %c0_i32_2 = arith.constant 0 : i32
    return %c0_i32, %c0_i32_0, %c0_i32_1 : i32, i32, i32
  }
  func.func @transform_3(%arg0: i32) -> (i32, i32) {
    %c0_i32 = arith.constant 0 : i32
    %c0_i32_0 = arith.constant 0 : i32
    return %arg0, %c0_i32 : i32, i32
  }
}

</mosaic_0001>

<bundles_post_ra>
// kernel: net_forward.1
= control target key start
LH: loop header
LB: loop body
LE: loop exit
PB: predicated region body
PF: predicated region fallthrough
CT: control target
= control target key end

     0   :  { %8 = vsyncpa [#allocation3], 0  ;;  %s1086_s0 = inlined_call_operand.vmem [shape: f32[8,128], index: 0, kind: input, shape index: {}]   ;;  %s1087_s1 = inlined_call_operand.hbm [shape: f32[5,128,128], index: 1, kind: input, shape index: {}]   ;;  %s1088_s2 = inlined_call_operand.vmem [shape: f32[5,1,128], index: 2, kind: input, shape index: {}]   ;;  %s1089_s3 = inlined_call_operand.hbm [shape: f32[8,128], index: 3, kind: output, shape index: {}]  }
   0x1   :  { %9 = vsyncpa [#allocation4], 0  ;;  %s967_s12 = smov [#allocation2]   ;;  %s919_s16 = scalar_lea.hbm %s1087_s1, 10240 }
   0x2   :  { %s17_s13 = sshll.u32 %s967_s12, 4  ;;  %p920_p0 = scmp.ne.s32.totalorder %s1087_s1, %s919_s16  ;;  %s18_s13 = int_to_ptr.vmem [resolvable:$true] %s17_s13 }
   0x3   :  { %p923_p1 = scmp.lt.u32.totalorder %s919_s16, %s1087_s1 }
   0x5   :  { %p925_p2 = pnand %p923_p1, %p920_p0 }
   0x7   :  { %928 = shalt.err (!%p925_p2)
}
   0x8   :  { %s929_s21 = scalar_lea.vmem %s18_s13, 10240  ;;  %p934_p4 = scmp.lt.s32.totalorder %s18_s13, %s18_s13 }
   0x9   :  { %p930_p3 = scmp.ne.s32.totalorder %s18_s13, %s929_s21  ;;  %p935_p5 = scmp.lt.s32.totalorder %s929_s21, %s929_s21 }
   0xb   :  { %p936_p6 = por %p935_p5, %p934_p4 }
   0xd   :  { %p937_p7 = pnand %p936_p6, %p930_p3 }
   0xf   :  { %940 = shalt.err (!%p937_p7)
}
  0x10   :  { %s968_s22 = smov 128   ;;  %s969_s23 = smov 8  }
  0x11   :  { %23 = dma.hbm_to_vmem [thread:$0]  %s1087_s1, 10240, %s18_s13, [#allocation3], %s968_s22, %s968_s22, %s969_s23  }
  0x12   :  { %963 = dma.done.wait [#allocation3], 10240  }
  0x13   :  { %964 = vsyncadd [#allocation3], 4294957056  ;;  %v970_v0 = vmov 0.0|0.0   ;;  %vm971_vm0 = vmmov 0   ;;  %v972_v1 = vmov 0.0   ;;  %v30_v2 = vld [vmem:[#allocation2] sm:$0xff] }
  0x14   :  { %792 = vmatprep.subr.bf16.mxu0 %v970_v0  ;;  %649 = vmatprep.mubr.msk.f32.mxu0 %vm971_vm0, %v972_v1  ;;  %v31_v3 = vld [vmem:[#allocation2 + $0x8] sm:$0xff]  ;;  %v32_v4 = vld [vmem:[#allocation2 + $0x10] sm:$0xff]  ;;  %v33_v6 = vld [vmem:[#allocation2 + $0x18] sm:$0xff]  ;;  %s973_s9 = smov [#allocation5]  }
  0x15   :  { %816 = vmatprep.subr.bf16.mxu1 %v970_v0  ;;  %684 = vmatprep.mubr.msk.f32.mxu1 %vm971_vm0, %v972_v1  ;;  %v793_v5 = vpack.c.bf16 %v31_v3, %v30_v2  ;;  %v796_v7 = vpack.c.bf16 %v33_v6, %v32_v4  ;;  %v34_v8 = vld [vmem:[#allocation2 + $0x20] sm:$0xff]  ;;  %v35_v9 = vld [vmem:[#allocation2 + $0x28] sm:$0xff]  ;;  %v127_v12 = vld [vmem:[#allocation2 + $0x90] sm:$0xff]  ;;  %s514_s10 = sshll.u32 %s973_s9, 4  ;;  %s515_s10 = int_to_ptr.vmem [resolvable:$true] %s514_s10 }
  0x16   :  { %v125_v10 = vld [vmem:[#allocation2 + $0x80] sm:$0xff]  ;;  %v126_v11 = vld [vmem:[#allocation2 + $0x88] sm:$0xff]  ;;  %v128_v13 = vld [vmem:[#allocation2 + $0x98] sm:$0xff]  ;;  %v799_v14 = vpack.c.bf16 %v35_v9, %v34_v8  ;;  %s941_s11 = scalar_lea.vmem %s515_s10, 128  ;;  %p946_p9 = scmp.lt.s32.totalorder %s515_s10, %s515_s10 }
  0x17   :  { %794 = vmatpush3.bf16.msra.mxu0 %v793_v5  ;;  %v817_v15 = vpack.c.bf16 %v126_v11, %v125_v10  ;;  %v36_v16 = vld [vmem:[#allocation2 + $0x30] sm:$0xff]  ;;  %v37_v17 = vld [vmem:[#allocation2 + $0x38] sm:$0xff]  ;;  %v820_v18 = vpack.c.bf16 %v128_v13, %v127_v12  ;;  %v129_v19 = vld [vmem:[#allocation2 + $0xa0] sm:$0xff]  ;;  %p942_p8 = scmp.ne.s32.totalorder %s515_s10, %s941_s11  ;;  %p947_p10 = scmp.lt.s32.totalorder %s941_s11, %s941_s11 }
  0x18   :  { %795 = vmatprep.subr.bf16.mxu0 %v970_v0  ;;  %v130_v20 = vld [vmem:[#allocation2 + $0xa8] sm:$0xff]  ;;  %v802_v21 = vpack.c.bf16 %v37_v17, %v36_v16  ;;  %v38_v22 = vld [vmem:[#allocation2 + $0x40] sm:$0xff]  ;;  %v131_v25 = vld [vmem:[#allocation2 + $0xb0] sm:$0xff] }
  0x19   :  { %818 = vmatpush3.bf16.msra.mxu1 %v817_v15  ;;  %v39_v23 = vld [vmem:[#allocation2 + $0x48] sm:$0xff]  ;;  %v823_v24 = vpack.c.bf16 %v130_v20, %v129_v19  ;;  %v132_v26 = vld [vmem:[#allocation2 + $0xb8] sm:$0xff]  ;;  %v40_v28 = vld [vmem:[#allocation2 + $0x50] sm:$0xff]  ;;  %p948_p11 = por %p947_p10, %p946_p9 }
  0x1a   :  { %819 = vmatprep.subr.bf16.mxu1 %v970_v0  ;;  %v805_v27 = vpack.c.bf16 %v39_v23, %v38_v22  ;;  %v41_v29 = vld [vmem:[#allocation2 + $0x58] sm:$0xff]  ;;  %v826_v30 = vpack.c.bf16 %v132_v26, %v131_v25  ;;  %v133_v31 = vld [vmem:[#allocation2 + $0xc0] sm:$0xff]  ;;  %v134_v32 = vld [vmem:[#allocation2 + $0xc8] sm:$0xff] }
  0x1b   :  { %797 = vmatpush3.bf16.msra.mxu0 %v796_v7  ;;  %v808_v33 = vpack.c.bf16 %v41_v29, %v40_v28  ;;  %v42_v34 = vld [vmem:[#allocation2 + $0x60] sm:$0xff]  ;;  %v43_v35 = vld [vmem:[#allocation2 + $0x68] sm:$0xff]  ;;  %v829_v36 = vpack.c.bf16 %v134_v32, %v133_v31  ;;  %v135_v37 = vld [vmem:[#allocation2 + $0xd0] sm:$0xff]  ;;  %p949_p12 = pnand %p948_p11, %p942_p8 }
  0x1c   :  { %798 = vmatprep.subr.bf16.mxu0 %v970_v0  ;;  %v136_v38 = vld [vmem:[#allocation2 + $0xd8] sm:$0xff]  ;;  %v811_v39 = vpack.c.bf16 %v43_v35, %v42_v34  ;;  %v44_v40 = vld [vmem:[#allocation2 + $0x70] sm:$0xff]  ;;  %v137_v43 = vld [vmem:[#allocation2 + $0xe0] sm:$0xff] }
  0x1d   :  { %821 = vmatpush3.bf16.msra.mxu1 %v820_v18  ;;  %v45_v41 = vld [vmem:[#allocation2 + $0x78] sm:$0xff]  ;;  %v832_v42 = vpack.c.bf16 %v136_v38, %v135_v37  ;;  %v138_v44 = vld [vmem:[#allocation2 + $0xe8] sm:$0xff]  ;;  %v139_v48 = vld [vmem:[#allocation2 + $0xf0] sm:$0xff] }
  0x1e   :  { %822 = vmatprep.subr.bf16.mxu1 %v970_v0  ;;  %v814_v45 = vpack.c.bf16 %v45_v41, %v44_v40  ;;  %v835_v46 = vpack.c.bf16 %v138_v44, %v137_v43  ;;  %v29_v47 = vld [vmem:[%s1086_s0] sm:$0xff]  ;;  %v221_v51 = vld [vmem:[#allocation2 + $0x100] sm:$0xff]  ;;  %v222_v52 = vld [vmem:[#allocation2 + $0x108] sm:$0xff] }
  0x1f   :  { %800 = vmatpush3.bf16.msra.mxu0 %v799_v14  ;;  %v140_v49 = vld [vmem:[#allocation2 + $0xf8] sm:$0xff]  ;;  %v223_v53 = vld [vmem:[#allocation2 + $0x110] sm:$0xff]  ;;  %v841_v54 = vpack.c.bf16 %v222_v52, %v221_v51  ;;  %v225_v57 = vld [vmem:[#allocation2 + $0x120] sm:$0xff] }
  0x20   :  { %801 = vmatprep.subr.bf16.mxu0 %v970_v0  ;;  %v838_v50 = vpack.c.bf16 %v140_v49, %v139_v48  ;;  %v224_v55 = vld [vmem:[#allocation2 + $0x118] sm:$0xff]  ;;  %v226_v58 = vld [vmem:[#allocation2 + $0x128] sm:$0xff]  ;;  %v227_v60 = vld [vmem:[#allocation2 + $0x130] sm:$0xff] }
  0x21   :  { %824 = vmatpush3.bf16.msra.mxu1 %v823_v24  ;;  %v844_v56 = vpack.c.bf16 %v224_v55, %v223_v53  ;;  %v847_v59 = vpack.c.bf16 %v226_v58, %v225_v57  ;;  %v228_v61 = vld [vmem:[#allocation2 + $0x138] sm:$0xff]  ;;  %v229_v63 = vld [vmem:[#allocation2 + $0x140] sm:$0xff]  ;;  %v230_v2 = vld [vmem:[#allocation2 + $0x148] sm:$0xff] }
  0x22   :  { %825 = vmatprep.subr.bf16.mxu1 %v970_v0  ;;  %v850_v62 = vpack.c.bf16 %v228_v61, %v227_v60  ;;  %v853_v3 = vpack.c.bf16 %v230_v2, %v229_v63  ;;  %v231_v4 = vld [vmem:[#allocation2 + $0x150] sm:$0xff]  ;;  %v232_v5 = vld [vmem:[#allocation2 + $0x158] sm:$0xff]  ;;  %v233_v7 = vld [vmem:[#allocation2 + $0x160] sm:$0xff] }
  0x23   :  { %803 = vmatpush3.bf16.msra.mxu0 %v802_v21  ;;  %v856_v6 = vpack.c.bf16 %v232_v5, %v231_v4  ;;  %v234_v8 = vld [vmem:[#allocation2 + $0x168] sm:$0xff]  ;;  %v523_v10 = vld [vmem:[%s1088_s2] ss:$0 sm:$0xff]  ;;  %v235_v15 = vld [vmem:[#allocation2 + $0x170] sm:$0xff] }
  0x24   :  { %804 = vmatprep.subr.bf16.mxu0 %v970_v0  ;;  %v859_v9 = vpack.c.bf16 %v234_v8, %v233_v7  ;;  %v236_v16 = vld [vmem:[#allocation2 + $0x178] sm:$0xff]  ;;  %v317_v18 = vld [vmem:[#allocation2 + $0x180] sm:$0xff]  ;;  %v318_v19 = vld [vmem:[#allocation2 + $0x188] sm:$0xff] }
  0x25   :  { %827 = vmatpush3.bf16.msra.mxu1 %v826_v30  ;;  %v862_v17 = vpack.c.bf16 %v236_v16, %v235_v15  ;;  %v319_v20 = vld [vmem:[#allocation2 + $0x190] sm:$0xff]  ;;  %v865_v21 = vpack.c.bf16 %v318_v19, %v317_v18  ;;  %v320_v22 = vld [vmem:[#allocation2 + $0x198] sm:$0xff]  ;;  %v321_v24 = vld [vmem:[#allocation2 + $0x1a0] sm:$0xff] }
  0x26   :  { %828 = vmatprep.subr.bf16.mxu1 %v970_v0  ;;  %v868_v23 = vpack.c.bf16 %v320_v22, %v319_v20  ;;  %v322_v25 = vld [vmem:[#allocation2 + $0x1a8] sm:$0xff]  ;;  %v324_v28 = vld [vmem:[#allocation2 + $0x1b8] sm:$0xff]  ;;  %v325_v30 = vld [vmem:[#allocation2 + $0x1c0] sm:$0xff] }
  0x27   :  { %806 = vmatpush3.bf16.msra.mxu0 %v805_v27  ;;  %v871_v26 = vpack.c.bf16 %v322_v25, %v321_v24  ;;  %v323_v27 = vld [vmem:[#allocation2 + $0x1b0] sm:$0xff]  ;;  %v326_v31 = vld [vmem:[#allocation2 + $0x1c8] sm:$0xff]  ;;  %v328_v34 = vld [vmem:[#allocation2 + $0x1d8] sm:$0xff] }
  0x28   :  { %807 = vmatprep.subr.bf16.mxu0 %v970_v0  ;;  %v874_v29 = vpack.c.bf16 %v324_v28, %v323_v27  ;;  %v877_v32 = vpack.c.bf16 %v326_v31, %v325_v30  ;;  %v330_v37 = vld [vmem:[#allocation2 + $0x1e8] sm:$0xff]  ;;  %v331_v44 = vld [vmem:[#allocation2 + $0x1f0] sm:$0xff]  ;;  %v416_v51 = vld [vmem:[#allocation2 + $0x218] sm:$0xff] }
  0x29   :  { %830 = vmatpush3.bf16.msra.mxu1 %v829_v36  ;;  %v329_v36 = vld [vmem:[#allocation2 + $0x1e0] sm:$0xff]  ;;  %v414_v48 = vld [vmem:[#allocation2 + $0x208] sm:$0xff]  ;;  %v415_v49 = vld [vmem:[#allocation2 + $0x210] sm:$0xff] }
  0x2a   :  { %831 = vmatprep.subr.bf16.mxu1 %v970_v0  ;;  %v883_v38 = vpack.c.bf16 %v330_v37, %v329_v36  ;;  %v892_v52 = vpack.c.bf16 %v416_v51, %v415_v49  ;;  %v417_v53 = vld [vmem:[#allocation2 + $0x220] sm:$0xff]  ;;  %v423_v61 = vld [vmem:[#allocation2 + $0x250] sm:$0xff]  ;;  %v527_v5 = vld [vmem:[%s1088_s2 + $0x2] ss:$0 sm:$0xff] }
  0x2b   :  { %809 = vmatpush3.bf16.msra.mxu0 %v808_v33  ;;  %v327_v33 = vld [vmem:[#allocation2 + $0x1d0] sm:$0xff]  ;;  %v421_v58 = vld [vmem:[#allocation2 + $0x240] sm:$0xff] }
  0x2c   :  { %810 = vmatprep.subr.bf16.mxu0 %v970_v0  ;;  %v880_v35 = vpack.c.bf16 %v328_v34, %v327_v33  ;;  %v425_v2 = vld [vmem:[#allocation2 + $0x260] sm:$0xff] }
  0x2d   :  { %833 = vmatpush3.bf16.msra.mxu1 %v832_v42 }
  0x2e   :  { %834 = vmatprep.subr.bf16.mxu1 %v970_v0 }
  0x2f   :  { %812 = vmatpush3.bf16.msra.mxu0 %v811_v39  ;;  %v525_v39 = vld [vmem:[%s1088_s2 + $0x1] ss:$0 sm:$0xff] }
  0x30   :  { %813 = vmatprep.subr.bf16.mxu0 %v970_v0 }
  0x31   :  { %836 = vmatpush3.bf16.msra.mxu1 %v835_v46 }
  0x32   :  { %837 = vmatprep.subr.bf16.mxu1 %v970_v0 }
  0x33   :  { %815 = vmatpush3.bf16.msra.mxu0 %v814_v45  ;;  %v332_v45 = vld [vmem:[#allocation2 + $0x1f8] sm:$0xff] }
  0x34   :  { %840 = vmatprep.subr.bf16.mxu0 %v970_v0  ;;  %v886_v46 = vpack.c.bf16 %v332_v45, %v331_v44 }
  0x35   :  { %839 = vmatpush3.bf16.msra.mxu1 %v838_v50 }
  0x36   :  { %650 = vmatmul.mubr.f32.vlgmr.msra.gmra.mrb[0].mxu0 %v29_v47  ;;  %864 = vmatprep.subr.bf16.mxu1 %v970_v0  ;;  %v413_v47 = vld [vmem:[#allocation2 + $0x200] sm:$0xff] }
  0x37   :  { %719 = vmatprep.mubr.msk.f32.mxu0 %vm971_vm0, %v972_v1  ;;  %842 = vmatpush3.bf16.msra.mxu0 %v841_v54  ;;  %v889_v50 = vpack.c.bf16 %v414_v48, %v413_v47  ;;  %v418_v54 = vld [vmem:[#allocation2 + $0x228] sm:$0xff] }
  0x38   :  { %843 = vmatprep.subr.bf16.mxu0 %v970_v0  ;;  %v895_v55 = vpack.c.bf16 %v418_v54, %v417_v53 }
  0x3b   :  { %845 = vmatpush3.bf16.msra.mxu0 %v844_v56  ;;  %v420_v56 = vld [vmem:[#allocation2 + $0x238] sm:$0xff] }
  0x3c   :  { %846 = vmatprep.subr.bf16.mxu0 %v970_v0 }
  0x3f   :  { %848 = vmatpush3.bf16.msra.mxu0 %v847_v59  ;;  %v422_v59 = vld [vmem:[#allocation2 + $0x248] sm:$0xff] }
  0x40   :  { %849 = vmatprep.subr.bf16.mxu0 %v970_v0  ;;  %v901_v60 = vpack.c.bf16 %v422_v59, %v421_v58 }
  0x43   :  { %851 = vmatpush3.bf16.msra.mxu0 %v850_v62  ;;  %v424_v62 = vld [vmem:[#allocation2 + $0x258] sm:$0xff] }
  0x44   :  { %852 = vmatprep.subr.bf16.mxu0 %v970_v0  ;;  %v904_v63 = vpack.c.bf16 %v424_v62, %v423_v61 }
  0x47   :  { %854 = vmatpush3.bf16.msra.mxu0 %v853_v3  ;;  %v426_v3 = vld [vmem:[#allocation2 + $0x268] sm:$0xff] }
  0x48   :  { %855 = vmatprep.subr.bf16.mxu0 %v970_v0  ;;  %v907_v4 = vpack.c.bf16 %v426_v3, %v425_v2 }
  0x4b   :  { %857 = vmatpush3.bf16.msra.mxu0 %v856_v6 }
  0x4c   :  { %858 = vmatprep.subr.bf16.mxu0 %v970_v0 }
  0x4f   :  { %860 = vmatpush3.bf16.msra.mxu0 %v859_v9 }
  0x50   :  { %861 = vmatprep.subr.bf16.mxu0 %v970_v0 }
  0x53   :  { %863 = vmatpush3.bf16.msra.mxu0 %v862_v17  ;;  %v531_v17 = vld [vmem:[%s1088_s2 + $0x4] ss:$0 sm:$0xff] }
  0x54   :  { %888 = vmatprep.subr.bf16.mxu0 %v970_v0 }
 0x109   :  { %v119_v11 = vpop.f32.mrb[0].mxu0 }
 0x10a   :  { %v120_v12 = vadd.f32 %v523_v10, %v119_v11  ;;  %v651_v13 = vpop.f32.mrb[1].mxu0  ;;  %v427_v10 = vld [vmem:[#allocation2 + $0x270] sm:$0xff]  ;;  %v428_v11 = vld [vmem:[#allocation2 + $0x278] sm:$0xff] }
 0x10b   :  { %v529_v13 = vld [vmem:[%s1088_s2 + $0x3] ss:$0 sm:$0xff] }
 0x10c   :  { %v123_v14 = vmax.f32 %v120_v12, 0.0  ;;  %v910_v12 = vpack.c.bf16 %v428_v11, %v427_v10 }
 0x10e   :  { %685 = vmatmul.mubr.f32.vlgmr.msra.gmra.mrb[0].mxu1 %v123_v14 }
 0x10f   :  { %754 = vmatprep.mubr.msk.f32.mxu1 %vm971_vm0, %v972_v1  ;;  %866 = vmatpush3.bf16.msra.mxu1 %v865_v21 }
 0x110   :  { %867 = vmatprep.subr.bf16.mxu1 %v970_v0 }
 0x113   :  { %869 = vmatpush3.bf16.msra.mxu1 %v868_v23 }
 0x114   :  { %870 = vmatprep.subr.bf16.mxu1 %v970_v0 }
 0x117   :  { %872 = vmatpush3.bf16.msra.mxu1 %v871_v26 }
 0x118   :  { %873 = vmatprep.subr.bf16.mxu1 %v970_v0 }
 0x11b   :  { %875 = vmatpush3.bf16.msra.mxu1 %v874_v29 }
 0x11c   :  { %876 = vmatprep.subr.bf16.mxu1 %v970_v0 }
 0x11f   :  { %878 = vmatpush3.bf16.msra.mxu1 %v877_v32 }
 0x120   :  { %879 = vmatprep.subr.bf16.mxu1 %v970_v0 }
 0x123   :  { %881 = vmatpush3.bf16.msra.mxu1 %v880_v35 }
 0x124   :  { %882 = vmatprep.subr.bf16.mxu1 %v970_v0 }
 0x127   :  { %884 = vmatpush3.bf16.msra.mxu1 %v883_v38 }
 0x128   :  { %885 = vmatprep.subr.bf16.mxu1 %v970_v0 }
 0x12b   :  { %887 = vmatpush3.bf16.msra.mxu1 %v886_v46 }
 0x1e1   :  { %v215_v40 = vpop.f32.mrb[0].mxu1 }
 0x1e2   :  { %v216_v41 = vadd.f32 %v525_v39, %v215_v40  ;;  %v686_v42 = vpop.f32.mrb[1].mxu1 }
 0x1e4   :  { %v219_v43 = vmax.f32 %v216_v41, 0.0 }
 0x1e6   :  { %720 = vmatmul.mubr.f32.vlgmr.msra.gmra.mrb[2].mxu0 %v219_v43 }
 0x1e7   :  { %789 = vmatprep.mubr.msk.f32.mxu0 %vm971_vm0, %v972_v1  ;;  %890 = vmatpush3.bf16.msra.mxu0 %v889_v50  ;;  %v419_v1 = vld [vmem:[#allocation2 + $0x230] sm:$0xff] }
 0x1e8   :  { %891 = vmatprep.subr.bf16.mxu0 %v970_v0  ;;  %v898_v57 = vpack.c.bf16 %v420_v56, %v419_v1 }
 0x1eb   :  { %893 = vmatpush3.bf16.msra.mxu0 %v892_v52 }
 0x1ec   :  { %894 = vmatprep.subr.bf16.mxu0 %v970_v0 }
 0x1ef   :  { %896 = vmatpush3.bf16.msra.mxu0 %v895_v55 }
 0x1f0   :  { %897 = vmatprep.subr.bf16.mxu0 %v970_v0 }
 0x1f3   :  { %899 = vmatpush3.bf16.msra.mxu0 %v898_v57 }
 0x1f4   :  { %900 = vmatprep.subr.bf16.mxu0 %v970_v0 }
 0x1f7   :  { %902 = vmatpush3.bf16.msra.mxu0 %v901_v60 }
 0x1f8   :  { %903 = vmatprep.subr.bf16.mxu0 %v970_v0 }
 0x1fb   :  { %905 = vmatpush3.bf16.msra.mxu0 %v904_v63 }
 0x1fc   :  { %906 = vmatprep.subr.bf16.mxu0 %v970_v0 }
 0x1ff   :  { %908 = vmatpush3.bf16.msra.mxu0 %v907_v4 }
 0x200   :  { %909 = vmatprep.subr.bf16.mxu0 %v970_v0 }
 0x203   :  { %911 = vmatpush3.bf16.msra.mxu0 %v910_v12 }
 0x2b9   :  { %v311_v6 = vpop.f32.mrb[2].mxu0 }
 0x2ba   :  { %v312_v7 = vadd.f32 %v527_v5, %v311_v6  ;;  %v721_v8 = vpop.f32.mrb[3].mxu0 }
 0x2bc   :  { %v315_v9 = vmax.f32 %v312_v7, 0.0 }
 0x2be   :  { %755 = vmatmul.mubr.f32.vlgmr.msra.gmra.mrb[2].mxu1 %v315_v9 }
 0x391   :  { %v407_v14 = vpop.f32.mrb[2].mxu1 }
 0x392   :  { %v408_v15 = vadd.f32 %v529_v13, %v407_v14  ;;  %v756_v0 = vpop.f32.mrb[3].mxu1 }
 0x394   :  { %v411_v16 = vmax.f32 %v408_v15, 0.0 }
 0x396   :  { %790 = vmatmul.mubr.f32.vlgmr.msra.gmra.mrb[4].mxu0 %v411_v16 }
 0x469   :  { %v503_v18 = vpop.f32.mrb[4].mxu0 }
 0x46a   :  { %v504_v19 = vadd.f32 %v531_v17, %v503_v18  ;;  %v791_v20 = vpop.f32.mrb[5].mxu0 }
 0x46c   :  { %507 = vst [vmem:[#allocation5] sm:$0xff] %v504_v19 }
 0x46d   :  { %952 = shalt.err (!%p949_p12)
}
 0x46e   :  { %s953_s14 = scalar_lea.hbm %s1089_s3, 128 }
 0x46f   :  { %p954_p13 = scmp.ne.s32.totalorder %s1089_s3, %s953_s14  ;;  %p957_p0 = scmp.lt.u32.totalorder %s953_s14, %s1089_s3 }
 0x471   :  { %p959_p1 = pnand %p957_p0, %p954_p13 }
 0x473   :  { %962 = shalt.err (!%p959_p1)
}
 0x474   :  { %517 = dma.vmem_to_hbm [thread:$0]  %s515_s10, 128, %s1089_s3, [#allocation4]  }
 0x475   :  { %965 = dma.done.wait [#allocation4], 128  }
 0x476   :  { %966 = vsyncadd [#allocation4], 4294967168 }
 0x477   :  { %521 = vsyncpa [#allocation3], 1 }
 0x478   :  { %522 = vsyncpa [#allocation4], 1 }

</bundles_post_ra>
